<compile_context>
chip_gen: v7x
topology: tpu7x:2x2x1
jax: 0.10.0
libtpu: 0.0.40
codegen_flags: <defaults>
</compile_context>

<pallas_src>
import jax
import jax.numpy as jnp
from jax.experimental import pallas as pl
from jax.experimental.pallas import tpu as pltpu


def eca_one_kernel(x_ref, m_ref, o_ref):
    # x_ref: (bt, C, HW)   input tile: channels on sublanes, pixels on lanes
    # m_ref: (C, C) f32    band matrix encoding the depthwise conv1d over channels
    # o_ref: (1, bt, HW)   dense output slab (last two block dims == full array dims)
    x = x_ref[...]                                           # keep input dtype
    hw = x_ref.shape[-1]
    # adaptive avg pool -> (bt, C); lane reduce with f32 accumulation
    pooled = jnp.sum(x, axis=-1, dtype=jnp.float32) * (1.0 / hw)
    # depthwise conv1d over the channel axis as an MXU matmul: y[b,c] = sum_i pooled[b,i]*M[i,c]
    y = jax.nn.sigmoid(
        jnp.dot(pooled, m_ref[...], preferred_element_type=jnp.float32))   # (bt, C) f32
    # channel-weighted sum: out[b,hw] = sum_c y[b,c] * x[b,c,hw]
    # (batched MXU matvec, f32 accumulation; MXU slack is free -- kernel is HBM-bound)
    out = jnp.einsum('bqc,bch->bqh', y[:, None, :].astype(x.dtype), x,
                     preferred_element_type=jnp.float32)                    # (bt, 1, HW)
    o_ref[0] = out[:, 0, :].astype(o_ref.dtype)


def make_band_matrix(weight, channel, k_size):
    # weight: (C, K) == torch Conv1d(C, C, K, groups=C, bias=False).weight[:, 0, :]
    # y[b, c] = sum_j weight[c, j] * pooled_padded[b, c + j - p],  p = (k-1)//2
    # => M[i, c] = weight[c, i - c + p] when 0 <= i - c + p < k, else 0.  (vectorized build)
    p = (k_size - 1) // 2
    w = weight.astype(jnp.float32)
    i_idx = jnp.arange(channel)[:, None]                     # (C, 1)
    c_idx = jnp.arange(channel)[None, :]                     # (1, C)
    j = i_idx - c_idx + p                                     # (C, C)
    valid = (j >= 0) & (j < k_size)
    j_c = jnp.clip(j, 0, k_size - 1)
    gathered = w[jnp.broadcast_to(c_idx, (channel, channel)), j_c]   # (C, C): W[c, j]
    return jnp.where(valid, gathered, jnp.zeros((), jnp.float32))


def _choose_batch_tile(b, per_batch_bytes, target_bytes=8 << 20):
    """Images per grid step: biggest divisor of b whose input tile stays ~<= 8 MiB."""
    bt_cap = max(1, int(target_bytes // per_batch_bytes))
    if bt_cap >= b:
        return b                                   # whole batch fits in one block
    for bt in range(bt_cap, 0, -1):                # exact divisor -> no padded/ragged block
        if b % bt == 0:
            return bt
    return 1
    # TODO(synk): very large per-image slabs (C*HW*itemsize >~ target) would want an
    # HW-tiled two-pass design (pooled-accumulation pass + weighted-sum pass).


def eca_layer_one_forward(x, weight, k_size):
    assert k_size % 2 == 1, "eca_layer_one requires odd k_size"
    b, c, h, w = x.shape
    hw = h * w
    itemsize = jnp.dtype(x.dtype).itemsize

    x_flat = x.reshape(b, c, hw)
    m = make_band_matrix(weight, c, k_size)

    bt = _choose_batch_tile(b, c * hw * itemsize)
    num_blocks = b // bt

    # VMEM budget: double-buffered input/output tiles + band matrix + f32 in-kernel temps.
    in_tile = bt * c * hw * itemsize
    out_tile = bt * hw * itemsize
    temps = bt * c * hw * 4 + bt * hw * 4
    need = 2 * in_tile + 2 * out_tile + 2 * c * c * 4 + temps + (2 << 20)
    vmem_limit = int(min(48 << 20, max(32 << 20, need)))

    out3d = pl.pallas_call(
        eca_one_kernel,
        out_shape=jax.ShapeDtypeStruct((num_blocks, bt, hw), x.dtype),
        grid_spec=pltpu.PrefetchScalarGridSpec(
            num_scalar_prefetch=0,
            grid=(num_blocks,),
            in_specs=[
                pl.BlockSpec((bt, c, hw), lambda i: (i, 0, 0)),
                pl.BlockSpec((c, c), lambda i: (0, 0)),
            ],
            out_specs=pl.BlockSpec((1, bt, hw), lambda i: (i, 0, 0)),
        ),
        compiler_params=pltpu.CompilerParams(
            dimension_semantics=("parallel",),
            vmem_limit_bytes=vmem_limit,
        ),
    )(x_flat, m)

    return out3d.reshape(b, hw).reshape(b, 1, h, w)


def ref_forward(x, weight, k_size):
    # pure-JAX reference of the PyTorch forward
    b, c, h, w = x.shape
    p = (k_size - 1) // 2
    pooled = jnp.mean(x.astype(jnp.float32), axis=(2, 3))          # (b, c)
    pooled_pad = jnp.pad(pooled, ((0, 0), (p, p)))                 # (b, c + 2p)
    y = jnp.zeros((b, c), dtype=jnp.float32)
    for j in range(k_size):
        y = y + weight.astype(jnp.float32)[None, :, j] * pooled_pad[:, j:j + c]
    y = jax.nn.sigmoid(y)
    out = jnp.sum(x.astype(jnp.float32) * y[:, :, None, None], axis=1, keepdims=True)
    return out.astype(x.dtype)


if __name__ == "__main__":
    B, C, H, W = 2, 4, 16, 16
    K = 3  # k_size (module requires odd k for its shapes to line up)

    key = jax.random.PRNGKey(0)
    kx, kw = jax.random.split(key)
    x = jax.random.normal(kx, (B, C, H, W), dtype=jnp.float32)
    # Conv1d(channel, channel, K, groups=channel, bias=False) weight: torch (C,1,K) -> (C,K)
    weight = jax.random.normal(kw, (C, K), dtype=jnp.float32) * 0.1

    out = eca_layer_one_forward(x, weight, K)
    out = jax.block_until_ready(out)

    ref = ref_forward(x, weight, K)
    assert out.shape == (B, 1, H, W), out.shape
    assert jnp.allclose(out, ref, atol=1e-5, rtol=1e-5), float(jnp.max(jnp.abs(out - ref)))
    print("KERNEL_OK")
</pallas_src>

<mosaic_0001>
module attributes {stable_mosaic.version = 11 : i64} {
  func.func @eca_one_kernel(%arg0: i32, %arg1: memref<2x4x256xf32, #tpu.memory_space<vmem>>, %arg2: memref<4x4xf32, #tpu.memory_space<vmem>>, %arg3: memref<1x2x256xf32, #tpu.memory_space<vmem>>) attributes {dimension_semantics = [#tpu.dimension_semantics<parallel>], iteration_bounds = array<i64: 1>, scalar_prefetch = 0 : i64, scratch_operands = 0 : i64, tpu.core_type = #tpu.core_type<tc>, window_params = [{transform_indices = @transform_0, window_bounds = array<i64: 2, 4, 256>}, {pipeline_mode = #tpu.pipeline_mode<synchronous>, transform_indices = @transform_1, window_bounds = array<i64: 4, 4>}, {transform_indices = @transform_2, window_bounds = array<i64: 1, 2, 256>}]} {
    %c0 = arith.constant 0 : index
    %c0_0 = arith.constant 0 : index
    %c0_1 = arith.constant 0 : index
    %0 = vector.load %arg1[%c0, %c0_0, %c0_1] : memref<2x4x256xf32, #tpu.memory_space<vmem>>, vector<2x4x256xf32>
    %cst = arith.constant dense<0.000000e+00> : vector<2x4xf32>
    %1 = vector.multi_reduction <add>, %0, %cst [2] : vector<2x4x256xf32> to vector<2x4xf32>
    %cst_2 = arith.constant 3.906250e-03 : f32
    %2 = vector.broadcast %cst_2 : f32 to vector<2x4xf32>
    %3 = arith.mulf %1, %2 : vector<2x4xf32>
    %c0_3 = arith.constant 0 : index
    %c0_4 = arith.constant 0 : index
    %4 = vector.load %arg2[%c0_3, %c0_4] : memref<4x4xf32, #tpu.memory_space<vmem>>, vector<4x4xf32>
    %cst_5 = arith.constant dense<0.000000e+00> : vector<2x4xf32>
    %5 = tpu.matmul %3, %4, %cst_5 {dimension_numbers = #tpu.dot_dimension_numbers<[1], [0], [0], [1], [0, 0, 1, 1], [], []>} : vector<2x4xf32>, vector<4x4xf32>, vector<2x4xf32> -> vector<2x4xf32>
    %6 = arith.negf %5 : vector<2x4xf32>
    %7 = math.exp %6 : vector<2x4xf32>
    %cst_6 = arith.constant 1.000000e+00 : f32
    %8 = vector.broadcast %cst_6 : f32 to vector<2x4xf32>
    %9 = arith.addf %8, %7 : vector<2x4xf32>
    %10 = arith.divf %8, %9 : vector<2x4xf32>
    %11 = vector.shape_cast %10 : vector<2x4xf32> to vector<2x1x4xf32>
    "tpu.trace_start"() <{level = 10 : i32, message = "bqc,bch->bqh"}> : () -> ()
    %cst_7 = arith.constant dense<0.000000e+00> : vector<2x1x256xf32>
    %12 = tpu.matmul %11, %0, %cst_7 {dimension_numbers = #tpu.dot_dimension_numbers<[2], [1], [1], [2], [0, 0, 0, 1, 1, 2], [0], [0]>} : vector<2x1x4xf32>, vector<2x4x256xf32>, vector<2x1x256xf32> -> vector<2x1x256xf32>
    "tpu.trace_stop"() : () -> ()
    %13 = vector.shape_cast %12 : vector<2x1x256xf32> to vector<2x256xf32>
    %c0_8 = arith.constant 0 : index
    %c0_9 = arith.constant 0 : index
    %c0_10 = arith.constant 0 : index
    %14 = vector.load %arg3[%c0_8, %c0_9, %c0_10] : memref<1x2x256xf32, #tpu.memory_space<vmem>>, vector<1x2x256xf32>
    %15 = vector.shape_cast %14 : vector<1x2x256xf32> to vector<2x256xf32>
    %16 = vector.shape_cast %13 : vector<2x256xf32> to vector<1x2x256xf32>
    tpu.vector_store %arg3[%c0_8, %c0_9, %c0_10], %16 {strides = array<i32>} : memref<1x2x256xf32, #tpu.memory_space<vmem>>, vector<1x2x256xf32>,
    return
  }
  func.func @transform_0(%arg0: i32) -> (i32, i32, i32) {
    %c0_i32 = arith.constant 0 : i32
    %c0_i32_0 = arith.constant 0 : i32
    %c0_i32_1 = arith.constant 0 : i32
    return %arg0, %c0_i32, %c0_i32_0 : i32, i32, i32
  }
  func.func @transform_1(%arg0: i32) -> (i32, i32) {
    %c0_i32 = arith.constant 0 : i32
    %c0_i32_0 = arith.constant 0 : i32
    %c0_i32_1 = arith.constant 0 : i32
    return %c0_i32, %c0_i32_0 : i32, i32
  }
  func.func @transform_2(%arg0: i32) -> (i32, i32, i32) {
    %c0_i32 = arith.constant 0 : i32
    %c0_i32_0 = arith.constant 0 : i32
    %c0_i32_1 = arith.constant 0 : i32
    return %arg0, %c0_i32, %c0_i32_0 : i32, i32, i32
  }
}

</mosaic_0001>

<bundles_post_ra>
// kernel: tpu_custom_call.1
= control target key start
LH: loop header
LB: loop body
LE: loop exit
PB: predicated region body
PF: predicated region fallthrough
CT: control target
= control target key end

     0   :  { %7 = vsyncpa [#allocation3], 0  ;;  %s560_s0 = inlined_call_operand.hbm [shape: f32[2,4,256], index: 0, kind: input, shape index: {}]   ;;  %s561_s1 = inlined_call_operand.hbm [shape: f32[4,4], index: 1, kind: input, shape index: {}]   ;;  %s562_s2 = inlined_call_operand.hbm [shape: f32[1,2,256], index: 2, kind: output, shape index: {}]  }
   0x1   :  { %8 = vsyncpa [#allocation6], 0 }
   0x2   :  { %9 = vsyncpa [#allocation4], 0  ;;  %s486_s9 = smov [#allocation2]   ;;  %s414_s13 = scalar_lea.hbm %s560_s0, 256 }
   0x3   :  { %s15_s10 = sshll.u32 %s486_s9, 4  ;;  %p415_p0 = scmp.ne.s32.totalorder %s560_s0, %s414_s13  ;;  %s16_s10 = int_to_ptr.vmem [resolvable:$true] %s15_s10 }
   0x4   :  { %p418_p1 = scmp.lt.u32.totalorder %s414_s13, %s560_s0 }
   0x6   :  { %p420_p2 = pnand %p418_p1, %p415_p0 }
   0x8   :  { %423 = shalt.err (!%p420_p2)
}
   0x9   :  { %s424_s18 = scalar_lea.vmem %s16_s10, 256  ;;  %p429_p4 = scmp.lt.s32.totalorder %s16_s10, %s16_s10 }
   0xa   :  { %p425_p3 = scmp.ne.s32.totalorder %s16_s10, %s424_s18  ;;  %p430_p5 = scmp.lt.s32.totalorder %s424_s18, %s424_s18 }
   0xc   :  { %p431_p6 = por %p430_p5, %p429_p4 }
   0xe   :  { %p432_p7 = pnand %p431_p6, %p425_p3 }
  0x10   :  { %435 = shalt.err (!%p432_p7)
}
  0x11   :  { %s487_s19 = smov 128   ;;  %s488_s20 = smov 8  }
  0x12   :  { %21 = dma.hbm_to_vmem [thread:$0]  %s560_s0, 256, %s16_s10, [#allocation3], %s487_s19, %s487_s19, %s488_s20  }
  0x13   :  { %s489_s23 = smov [#allocation5]   ;;  %s436_s27 = scalar_lea.hbm %s561_s1, 64 }
  0x14   :  { %s28_s24 = sshll.u32 %s489_s23, 4  ;;  %p437_p8 = scmp.ne.s32.totalorder %s561_s1, %s436_s27  ;;  %s29_s24 = int_to_ptr.vmem [resolvable:$true] %s28_s24 }
  0x15   :  { %p440_p9 = scmp.lt.u32.totalorder %s436_s27, %s561_s1 }
  0x17   :  { %p442_p10 = pnand %p440_p9, %p437_p8 }
  0x19   :  { %445 = shalt.err (!%p442_p10)
}
  0x1a   :  { %s446_s4 = scalar_lea.vmem %s29_s24, 64  ;;  %p451_p12 = scmp.lt.s32.totalorder %s29_s24, %s29_s24 }
  0x1b   :  { %p447_p11 = scmp.ne.s32.totalorder %s29_s24, %s446_s4  ;;  %p452_p13 = scmp.lt.s32.totalorder %s446_s4, %s446_s4 }
  0x1d   :  { %p453_p0 = por %p452_p13, %p451_p12 }
  0x1f   :  { %p454_p1 = pnand %p453_p0, %p447_p11 }
  0x21   :  { %457 = shalt.err (!%p454_p1)
}
  0x22   :  { %31 = dma.hbm_to_vmem [thread:$0]  %s561_s1, 64, %s29_s24, [#allocation6]  }
  0x23   :  { %480 = dma.done.wait [#allocation3], 256  }
  0x24   :  { %481 = vsyncadd [#allocation3], 4294967040 }
  0x25   :  { %482 = dma.done.wait [#allocation6], 64  }
  0x26   :  { %483 = vsyncadd [#allocation6], 4294967232  ;;  %vm46_vm0 = vcmask 1043456   ;;  %v38_v0 = vld [vmem:[#allocation2] sm:$0xff]  ;;  %v39_v1 = vld [vmem:[#allocation2 + $0x8] sm:$0xff]  ;;  %v490_v11 = vmov 0.0   ;;  %v62_v12 = vlaneseq }
  0x27   :  { %v42_v2 = vcombine.high %v38_v0, %v38_v0  ;;  %v47_v3 = vsel %vm46_vm0, %v38_v0, 0.0  ;;  %v43_v4 = vcombine.high %v39_v1, %v39_v1  ;;  %v52_v6 = vsel %vm46_vm0, %v39_v1, 0.0  ;;  %v59_v10 = vld [vmem:[#allocation5] sm:$0xf]  ;;  %394 = vmatprep.subr.mxu0 %v490_v11  ;;  %249 = vmatprep.mubr.f32.mxu1 %v490_v11  ;;  %s494_s1 = smov [#allocation7]  }
  0x28   :  { %vm491_vm1 = vmmov 0   ;;  %395 = vmatpush3.msk.msra.mxu0 %vm46_vm0, %v59_v10  ;;  %v63_v13 = vand.u32 127, %v62_v12  ;;  %v65_v14 = vshrl.u32 %v62_v12, 7  ;;  %vm72_vm2 = vcmask 1041409   ;;  %s373_s6 = sshll.u32 %s494_s1, 4  ;;  %s374_s6 = int_to_ptr.vmem [resolvable:$true] %s373_s6 }
  0x29   :  { %v48_v5 = vsel %vm46_vm0, %v42_v2, 0.0  ;;  %v53_v7 = vsel %vm46_vm0, %v43_v4, 0.0  ;;  %386 = vmatprep.subr.msk.mxu1 %vm46_vm0, %v42_v2  ;;  %396 = vmatprep.mubr.msk.f32.mxu0 %vm491_vm1, %v490_v11  ;;  %vm74_vm3 = vcmask 31744   ;;  %v492_v28 = vmov 1966171168   ;;  %s458_s7 = scalar_lea.vmem %s374_s6, 64  ;;  %p463_p3 = scmp.lt.s32.totalorder %s374_s6, %s374_s6 }
  0x2a   :  { %v49_v8 = vadd.f32 %v48_v5, %v47_v3  ;;  %387 = vmatpush1.msk.msra.mxu1 %vm46_vm0, %v38_v0  ;;  %v54_v9 = vadd.f32 %v53_v7, %v52_v6  ;;  %389 = vmatprep.subr.msk.mxu0 %vm46_vm0, %v43_v4  ;;  %v66_v16 = vsub.s32 %v63_v13, %v65_v14  ;;  %v158_v29 = vunpack.c.l.s4 %v492_v28  ;;  %p459_p2 = scmp.ne.s32.totalorder %s374_s6, %s458_s7  ;;  %p464_p4 = scmp.lt.s32.totalorder %s458_s7, %s458_s7 }
  0x2b   :  { %v493_v37 = vmov 1983009808   ;;  %vm359_vm4 = vcmask 1043459   ;;  %vm361_vm5 = vcmask 1045509   ;;  %vm363_vm6 = vcmask 1047559  }
  0x2c   :  { %50 = vadd.xlane.f32.xlu0 %v49_v8  ;;  %v159_v30 = vunpack.c.0.s8 %v158_v29  ;;  %v339_v38 = vunpack.c.l.s4 %v493_v37  ;;  %p465_p5 = por %p464_p4, %p463_p3 }
  0x2e   :  { %v162_v31 = vsub.s32 %v159_v30, %v65_v14  ;;  %v340_v40 = vunpack.c.0.s8 %v339_v38  ;;  %p466_p6 = pnand %p465_p5, %p459_p2 }
  0x30   :  { %55 = vadd.xlane.f32.xlu0 %v54_v9  ;;  %v343_v45 = vsub.s32 %v340_v40, %v65_v14 }
  0xb9   :  { %v51_v15 = vpop.xlane.xlu0 %50 }
  0xba   :  { %v57_v17 = vmul.f32 0.00390625, %v51_v15 }
  0xbc   :  { %v67_v20 = vrot.slane %v57_v17, %v66_v16 }
  0xbd   :  { %v56_v18 = vpop.xlane.xlu0 %55 }
  0xbe   :  { %v58_v19 = vmul.f32 0.00390625, %v56_v18 }
  0xc0   :  { %v71_v21 = vrot.slane %v58_v19, %v66_v16 }
  0xc2   :  { %v73_v22 = vsel %vm72_vm2, %v71_v21, %v67_v20 }
  0xc3   :  { %397 = vmatmul.mubr.msk.f32.vlgmr.msra.gmra.mrb[0].mxu0 %vm74_vm3, %v73_v22 }
  0xc4   :  { %390 = vmatpush1.msk.msra.mxu0 %vm46_vm0, %v39_v1  ;;  %326 = vmatprep.mubr.f32.mxu0 %v490_v11 }
 0x196   :  { %v146_v23 = vpop.f32.mrb[0].mxu0 }
 0x197   :  { %v385_v24 = vmul.f32 -1.442695, %v146_v23  ;;  %v398_v25 = vpop.f32.mrb[1].mxu0 }
 0x199   :  { %410 = vpow2.f32 %v385_v24 }
 0x1a3   :  { %v411_v26 = vpop.eup %410 }
 0x1a4   :  { %v153_v27 = vadd.f32 1.0, %v411_v26 }
 0x1a6   :  { %412 = vrcp.f32 %v153_v27 }
 0x1b0   :  { %v413_v32 = vpop.eup %412 }
 0x1b1   :  { %v163_v33 = vrot.slane %v413_v32, %v162_v31 }
 0x1b3   :  { %v164_v34 = vcombine.high %v163_v33, %v163_v33  ;;  %v171_v35 = vrot.slane %v163_v33, %v162_v31 }
 0x1b5   :  { %388 = vmatmul.mubr.msk.f32.vlgmr.msra.gmra.mrb[0].mxu1 %vm74_vm3, %v171_v35  ;;  %v178_v36 = vrot.slane %v164_v34, %v162_v31 }
 0x1b7   :  { %391 = vmatmul.mubr.msk.f32.vlgmr.msra.gmra.mrb[2].mxu0 %vm74_vm3, %v178_v36 }
 0x288   :  { %v251_v39 = vpop.f32.mrb[0].mxu1 }
 0x289   :  { %v253_v41 = vpop.f32.mrb[1].mxu1 }
 0x28a   :  { %v337_v42 = vcombine.low %v251_v39, %v253_v41  ;;  %v328_v43 = vpop.f32.mrb[2].mxu0 }
 0x28b   :  { %v330_v44 = vpop.f32.mrb[3].mxu0 }
 0x28c   :  { %v345_v46 = vcombine.low %v328_v43, %v330_v44  ;;  %v344_v48 = vrot.slane %v337_v42, %v343_v45 }
 0x28e   :  { %v352_v47 = vrot.slane %v345_v46, %v343_v45 }
 0x290   :  { %v357_v49 = vrot.slane %v352_v47, 7 }
 0x292   :  { %v358_v50 = vsel %vm72_vm2, %v357_v49, %v344_v48 }
 0x293   :  { %v360_v51 = vsel %vm359_vm4, %v357_v49, %v358_v50 }
 0x294   :  { %v362_v52 = vsel %vm361_vm5, %v357_v49, %v360_v51 }
 0x295   :  { %v364_v53 = vsel %vm363_vm6, %v357_v49, %v362_v52 }
 0x296   :  { %366 = vst [vmem:[#allocation7] sm:$0xf] %v364_v53 }
 0x297   :  { %469 = shalt.err (!%p466_p6)
}
 0x298   :  { %s470_s10 = scalar_lea.hbm %s562_s2, 64 }
 0x299   :  { %p471_p7 = scmp.ne.s32.totalorder %s562_s2, %s470_s10  ;;  %p474_p8 = scmp.lt.u32.totalorder %s470_s10, %s562_s2 }
 0x29b   :  { %p476_p9 = pnand %p474_p8, %p471_p7 }
 0x29d   :  { %479 = shalt.err (!%p476_p9)
}
 0x29e   :  { %376 = dma.vmem_to_hbm [thread:$0]  %s374_s6, 64, %s562_s2, [#allocation4]  }
 0x29f   :  { %484 = dma.done.wait [#allocation4], 64  }
 0x2a0   :  { %485 = vsyncadd [#allocation4], 4294967232 }
 0x2a1   :  { %380 = vsyncpa [#allocation3], 1 }
 0x2a2   :  { %381 = vsyncpa [#allocation6], 1 }
 0x2a3   :  { %382 = vsyncpa [#allocation4], 1 }

</bundles_post_ra>
